<compile_context>
chip_gen: v7x
topology: tpu7x:2x2x1
jax: 0.10.0
libtpu: 0.0.40
codegen_flags: <defaults>
</compile_context>

<pallas_src>
import functools

import jax
import jax.numpy as jnp
from jax.experimental import pallas as pl
from jax.experimental.pallas import tpu as pltpu

_LANE = 128


def _softmax_stack_kernel(x_ref, o_ref, *, num_layers):
    # x_ref / o_ref: (B_blk, C, S_blk).  Softmax axis is dim 1 (C), matching
    # nn.Softmax(dim=1) on an NCHW tensor reshaped to (N, C, H*W).
    x = x_ref[...].astype(jnp.float32)

    # --- Layer 0: stabilized softmax (inputs are arbitrary-range) ---
    m = jnp.max(x, axis=1, keepdims=True)            # XLU sublane reduce
    e = jnp.exp(x - m)                                # EUP
    s = jnp.sum(e, axis=1, keepdims=True)
    inv = pl.reciprocal(s, approx=True)               # EUP, reduced row only
    inv = inv * (2.0 - s * inv)                       # one Newton step (1e-5 tol)
    x = e * inv

    # --- Layers 1..n-1: x in (0, 1] -> exp cannot overflow, skip the max ---
    for _ in range(num_layers - 1):
        e = jnp.exp(x)                                # EUP
        s = jnp.sum(e, axis=1, keepdims=True)
        inv = pl.reciprocal(s, approx=True)
        inv = inv * (2.0 - s * inv)
        x = e * inv

    o_ref[...] = x.astype(o_ref.dtype)


def _largest_divisor_leq(n, cap):
    """Largest divisor of n that is <= cap (>= 1)."""
    cap = max(1, min(n, cap))
    for d in range(cap, 0, -1):
        if n % d == 0:
            return d
    return 1


def _choose_tiles(N, C, S_pad, itemsize,
                  target_bytes=1 << 20, max_bytes=4 << 20):
    """Pick (B_blk, S_blk) so blocks are ~target_bytes and grid has >=2 steps
    when possible (v7x megacore).  S_blk is always a multiple of 128."""
    row_bytes = C * S_pad * itemsize                  # one batch row, full S
    if row_bytes <= target_bytes:
        # Pack batch rows into the block.
        b_blk = _largest_divisor_leq(N, max(1, target_bytes // row_bytes))
        s_blk = S_pad
    else:
        # Tile the lane (spatial) axis instead.
        b_blk = 1
        n_tiles = S_pad // _LANE
        tile_bytes = C * _LANE * itemsize
        s_tiles = _largest_divisor_leq(n_tiles, max(1, max_bytes // tile_bytes))
        s_blk = s_tiles * _LANE

    # Keep >= 2 grid steps when the problem allows it (v7x has 2 TensorCores).
    if (N // b_blk) * (S_pad // s_blk) == 1:
        if N >= 2 and b_blk == N:
            b_blk = _largest_divisor_leq(N, b_blk // 2)
        elif S_pad >= 2 * _LANE and s_blk == S_pad:
            s_tiles = _largest_divisor_leq(S_pad // _LANE, (S_pad // _LANE) // 2)
            s_blk = s_tiles * _LANE
    return b_blk, s_blk


def softmax_stack(x_nchw, num_layers=10):
    """Equivalent of softmax.forward: applies Softmax(dim=1) `num_layers` times.

    x_nchw: (N, C, H, W) -> (N, C, H, W)
    """
    N, C, H, W = x_nchw.shape
    S = H * W
    x3 = x_nchw.reshape(N, C, S)

    # Pad the lane axis to a multiple of 128 so stores are unmasked `vst`.
    S_pad = ((S + _LANE - 1) // _LANE) * _LANE
    if S_pad != S:
        x3 = jnp.pad(x3, ((0, 0), (0, 0), (0, S_pad - S)))

    itemsize = jnp.dtype(x_nchw.dtype).itemsize
    b_blk, s_blk = _choose_tiles(N, C, S_pad, itemsize)
    grid = (N // b_blk, S_pad // s_blk)

    kernel = functools.partial(_softmax_stack_kernel, num_layers=num_layers)
    out = pl.pallas_call(
        kernel,
        out_shape=jax.ShapeDtypeStruct((N, C, S_pad), x_nchw.dtype),
        grid_spec=pltpu.PrefetchScalarGridSpec(
            num_scalar_prefetch=0,
            grid=grid,
            in_specs=[pl.BlockSpec((b_blk, C, s_blk), lambda n, s: (n, 0, s))],
            out_specs=pl.BlockSpec((b_blk, C, s_blk), lambda n, s: (n, 0, s)),
        ),
        compiler_params=pltpu.CompilerParams(
            dimension_semantics=("parallel", "parallel"),
            vmem_limit_bytes=32 * 1024 * 1024,
        ),
    )(x3)

    if S_pad != S:
        out = out[:, :, :S]
    return out.reshape(N, C, H, W)


if __name__ == "__main__":
    key = jax.random.PRNGKey(0)

    layer, channels = 10, 32
    N, H, W = 2, 16, 16
    x = jax.random.normal(key, (N, channels, H, W), jnp.float32)  # NCHW input

    out = softmax_stack(x, num_layers=layer)
    jax.block_until_ready(out)

    # Reference: 10 repeated softmaxes over dim=1 (channel), same as the module.
    ref = x
    for _ in range(layer):
        ref = jax.nn.softmax(ref, axis=1)

    assert out.shape == (N, channels, H, W)
    assert out.dtype == jnp.float32
    assert jnp.allclose(out, ref, atol=1e-5, rtol=1e-5)
    print("KERNEL_OK")
</pallas_src>

<mosaic_0001>
module attributes {stable_mosaic.version = 11 : i64} {
  func.func @_softmax_stack_kernel(%arg0: i32, %arg1: i32, %arg2: memref<1x32x256xf32, #tpu.memory_space<vmem>>, %arg3: memref<1x32x256xf32, #tpu.memory_space<vmem>>) attributes {dimension_semantics = [#tpu.dimension_semantics<parallel>, #tpu.dimension_semantics<parallel>], iteration_bounds = array<i64: 2, 1>, scalar_prefetch = 0 : i64, scratch_operands = 0 : i64, tpu.core_type = #tpu.core_type<tc>, window_params = [{transform_indices = @transform_0, window_bounds = array<i64: 1, 32, 256>}, {transform_indices = @transform_1, window_bounds = array<i64: 1, 32, 256>}]} {
    %c0 = arith.constant 0 : index
    %c0_0 = arith.constant 0 : index
    %c0_1 = arith.constant 0 : index
    %0 = vector.load %arg2[%c0, %c0_0, %c0_1] : memref<1x32x256xf32, #tpu.memory_space<vmem>>, vector<1x32x256xf32>
    %cst = arith.constant dense<0xFF800000> : vector<1x256xf32>
    %1 = vector.multi_reduction <maximumf>, %0, %cst [1] : vector<1x32x256xf32> to vector<1x256xf32>
    %2 = vector.shape_cast %1 : vector<1x256xf32> to vector<1x1x256xf32>
    %3 = vector.broadcast %2 : vector<1x1x256xf32> to vector<1x32x256xf32>
    %4 = arith.subf %0, %3 : vector<1x32x256xf32>
    %5 = math.exp %4 : vector<1x32x256xf32>
    %cst_2 = arith.constant dense<0.000000e+00> : vector<1x256xf32>
    %6 = vector.multi_reduction <add>, %5, %cst_2 [1] : vector<1x32x256xf32> to vector<1x256xf32>
    %7 = vector.shape_cast %6 : vector<1x256xf32> to vector<1x1x256xf32>
    %8 = tpu.reciprocal %7 {approx = true} : vector<1x1x256xf32> -> vector<1x1x256xf32>
    %9 = arith.mulf %7, %8 : vector<1x1x256xf32>
    %cst_3 = arith.constant 2.000000e+00 : f32
    %10 = vector.broadcast %cst_3 : f32 to vector<1x1x256xf32>
    %11 = arith.subf %10, %9 : vector<1x1x256xf32>
    %12 = arith.mulf %8, %11 : vector<1x1x256xf32>
    %13 = vector.broadcast %12 : vector<1x1x256xf32> to vector<1x32x256xf32>
    %14 = arith.mulf %5, %13 : vector<1x32x256xf32>
    %15 = math.exp %14 : vector<1x32x256xf32>
    %cst_4 = arith.constant dense<0.000000e+00> : vector<1x256xf32>
    %16 = vector.multi_reduction <add>, %15, %cst_4 [1] : vector<1x32x256xf32> to vector<1x256xf32>
    %17 = vector.shape_cast %16 : vector<1x256xf32> to vector<1x1x256xf32>
    %18 = tpu.reciprocal %17 {approx = true} : vector<1x1x256xf32> -> vector<1x1x256xf32>
    %19 = arith.mulf %17, %18 : vector<1x1x256xf32>
    %cst_5 = arith.constant 2.000000e+00 : f32
    %20 = vector.broadcast %cst_5 : f32 to vector<1x1x256xf32>
    %21 = arith.subf %20, %19 : vector<1x1x256xf32>
    %22 = arith.mulf %18, %21 : vector<1x1x256xf32>
    %23 = vector.broadcast %22 : vector<1x1x256xf32> to vector<1x32x256xf32>
    %24 = arith.mulf %15, %23 : vector<1x32x256xf32>
    %25 = math.exp %24 : vector<1x32x256xf32>
    %cst_6 = arith.constant dense<0.000000e+00> : vector<1x256xf32>
    %26 = vector.multi_reduction <add>, %25, %cst_6 [1] : vector<1x32x256xf32> to vector<1x256xf32>
    %27 = vector.shape_cast %26 : vector<1x256xf32> to vector<1x1x256xf32>
    %28 = tpu.reciprocal %27 {approx = true} : vector<1x1x256xf32> -> vector<1x1x256xf32>
    %29 = arith.mulf %27, %28 : vector<1x1x256xf32>
    %cst_7 = arith.constant 2.000000e+00 : f32
    %30 = vector.broadcast %cst_7 : f32 to vector<1x1x256xf32>
    %31 = arith.subf %30, %29 : vector<1x1x256xf32>
    %32 = arith.mulf %28, %31 : vector<1x1x256xf32>
    %33 = vector.broadcast %32 : vector<1x1x256xf32> to vector<1x32x256xf32>
    %34 = arith.mulf %25, %33 : vector<1x32x256xf32>
    %35 = math.exp %34 : vector<1x32x256xf32>
    %cst_8 = arith.constant dense<0.000000e+00> : vector<1x256xf32>
    %36 = vector.multi_reduction <add>, %35, %cst_8 [1] : vector<1x32x256xf32> to vector<1x256xf32>
    %37 = vector.shape_cast %36 : vector<1x256xf32> to vector<1x1x256xf32>
    %38 = tpu.reciprocal %37 {approx = true} : vector<1x1x256xf32> -> vector<1x1x256xf32>
    %39 = arith.mulf %37, %38 : vector<1x1x256xf32>
    %cst_9 = arith.constant 2.000000e+00 : f32
    %40 = vector.broadcast %cst_9 : f32 to vector<1x1x256xf32>
    %41 = arith.subf %40, %39 : vector<1x1x256xf32>
    %42 = arith.mulf %38, %41 : vector<1x1x256xf32>
    %43 = vector.broadcast %42 : vector<1x1x256xf32> to vector<1x32x256xf32>
    %44 = arith.mulf %35, %43 : vector<1x32x256xf32>
    %45 = math.exp %44 : vector<1x32x256xf32>
    %cst_10 = arith.constant dense<0.000000e+00> : vector<1x256xf32>
    %46 = vector.multi_reduction <add>, %45, %cst_10 [1] : vector<1x32x256xf32> to vector<1x256xf32>
    %47 = vector.shape_cast %46 : vector<1x256xf32> to vector<1x1x256xf32>
    %48 = tpu.reciprocal %47 {approx = true} : vector<1x1x256xf32> -> vector<1x1x256xf32>
    %49 = arith.mulf %47, %48 : vector<1x1x256xf32>
    %cst_11 = arith.constant 2.000000e+00 : f32
    %50 = vector.broadcast %cst_11 : f32 to vector<1x1x256xf32>
    %51 = arith.subf %50, %49 : vector<1x1x256xf32>
    %52 = arith.mulf %48, %51 : vector<1x1x256xf32>
    %53 = vector.broadcast %52 : vector<1x1x256xf32> to vector<1x32x256xf32>
    %54 = arith.mulf %45, %53 : vector<1x32x256xf32>
    %55 = math.exp %54 : vector<1x32x256xf32>
    %cst_12 = arith.constant dense<0.000000e+00> : vector<1x256xf32>
    %56 = vector.multi_reduction <add>, %55, %cst_12 [1] : vector<1x32x256xf32> to vector<1x256xf32>
    %57 = vector.shape_cast %56 : vector<1x256xf32> to vector<1x1x256xf32>
    %58 = tpu.reciprocal %57 {approx = true} : vector<1x1x256xf32> -> vector<1x1x256xf32>
    %59 = arith.mulf %57, %58 : vector<1x1x256xf32>
    %cst_13 = arith.constant 2.000000e+00 : f32
    %60 = vector.broadcast %cst_13 : f32 to vector<1x1x256xf32>
    %61 = arith.subf %60, %59 : vector<1x1x256xf32>
    %62 = arith.mulf %58, %61 : vector<1x1x256xf32>
    %63 = vector.broadcast %62 : vector<1x1x256xf32> to vector<1x32x256xf32>
    %64 = arith.mulf %55, %63 : vector<1x32x256xf32>
    %65 = math.exp %64 : vector<1x32x256xf32>
    %cst_14 = arith.constant dense<0.000000e+00> : vector<1x256xf32>
    %66 = vector.multi_reduction <add>, %65, %cst_14 [1] : vector<1x32x256xf32> to vector<1x256xf32>
    %67 = vector.shape_cast %66 : vector<1x256xf32> to vector<1x1x256xf32>
    %68 = tpu.reciprocal %67 {approx = true} : vector<1x1x256xf32> -> vector<1x1x256xf32>
    %69 = arith.mulf %67, %68 : vector<1x1x256xf32>
    %cst_15 = arith.constant 2.000000e+00 : f32
    %70 = vector.broadcast %cst_15 : f32 to vector<1x1x256xf32>
    %71 = arith.subf %70, %69 : vector<1x1x256xf32>
    %72 = arith.mulf %68, %71 : vector<1x1x256xf32>
    %73 = vector.broadcast %72 : vector<1x1x256xf32> to vector<1x32x256xf32>
    %74 = arith.mulf %65, %73 : vector<1x32x256xf32>
    %75 = math.exp %74 : vector<1x32x256xf32>
    %cst_16 = arith.constant dense<0.000000e+00> : vector<1x256xf32>
    %76 = vector.multi_reduction <add>, %75, %cst_16 [1] : vector<1x32x256xf32> to vector<1x256xf32>
    %77 = vector.shape_cast %76 : vector<1x256xf32> to vector<1x1x256xf32>
    %78 = tpu.reciprocal %77 {approx = true} : vector<1x1x256xf32> -> vector<1x1x256xf32>
    %79 = arith.mulf %77, %78 : vector<1x1x256xf32>
    %cst_17 = arith.constant 2.000000e+00 : f32
    %80 = vector.broadcast %cst_17 : f32 to vector<1x1x256xf32>
    %81 = arith.subf %80, %79 : vector<1x1x256xf32>
    %82 = arith.mulf %78, %81 : vector<1x1x256xf32>
    %83 = vector.broadcast %82 : vector<1x1x256xf32> to vector<1x32x256xf32>
    %84 = arith.mulf %75, %83 : vector<1x32x256xf32>
    %85 = math.exp %84 : vector<1x32x256xf32>
    %cst_18 = arith.constant dense<0.000000e+00> : vector<1x256xf32>
    %86 = vector.multi_reduction <add>, %85, %cst_18 [1] : vector<1x32x256xf32> to vector<1x256xf32>
    %87 = vector.shape_cast %86 : vector<1x256xf32> to vector<1x1x256xf32>
    %88 = tpu.reciprocal %87 {approx = true} : vector<1x1x256xf32> -> vector<1x1x256xf32>
    %89 = arith.mulf %87, %88 : vector<1x1x256xf32>
    %cst_19 = arith.constant 2.000000e+00 : f32
    %90 = vector.broadcast %cst_19 : f32 to vector<1x1x256xf32>
    %91 = arith.subf %90, %89 : vector<1x1x256xf32>
    %92 = arith.mulf %88, %91 : vector<1x1x256xf32>
    %93 = vector.broadcast %92 : vector<1x1x256xf32> to vector<1x32x256xf32>
    %94 = arith.mulf %85, %93 : vector<1x32x256xf32>
    %95 = math.exp %94 : vector<1x32x256xf32>
    %cst_20 = arith.constant dense<0.000000e+00> : vector<1x256xf32>
    %96 = vector.multi_reduction <add>, %95, %cst_20 [1] : vector<1x32x256xf32> to vector<1x256xf32>
    %97 = vector.shape_cast %96 : vector<1x256xf32> to vector<1x1x256xf32>
    %98 = tpu.reciprocal %97 {approx = true} : vector<1x1x256xf32> -> vector<1x1x256xf32>
    %99 = arith.mulf %97, %98 : vector<1x1x256xf32>
    %cst_21 = arith.constant 2.000000e+00 : f32
    %100 = vector.broadcast %cst_21 : f32 to vector<1x1x256xf32>
    %101 = arith.subf %100, %99 : vector<1x1x256xf32>
    %102 = arith.mulf %98, %101 : vector<1x1x256xf32>
    %103 = vector.broadcast %102 : vector<1x1x256xf32> to vector<1x32x256xf32>
    %104 = arith.mulf %95, %103 : vector<1x32x256xf32>
    %c0_22 = arith.constant 0 : index
    %c0_23 = arith.constant 0 : index
    %c0_24 = arith.constant 0 : index
    %105 = vector.load %arg3[%c0_22, %c0_23, %c0_24] : memref<1x32x256xf32, #tpu.memory_space<vmem>>, vector<1x32x256xf32>
    tpu.vector_store %arg3[%c0_22, %c0_23, %c0_24], %104 {strides = array<i32>} : memref<1x32x256xf32, #tpu.memory_space<vmem>>, vector<1x32x256xf32>,
    return
  }
  func.func @transform_0(%arg0: i32, %arg1: i32) -> (i32, i32, i32) {
    %c0_i32 = arith.constant 0 : i32
    %c0_i32_0 = arith.constant 0 : i32
    return %arg0, %c0_i32, %arg1 : i32, i32, i32
  }
  func.func @transform_1(%arg0: i32, %arg1: i32) -> (i32, i32, i32) {
    %c0_i32 = arith.constant 0 : i32
    %c0_i32_0 = arith.constant 0 : i32
    return %arg0, %c0_i32, %arg1 : i32, i32, i32
  }
}

</mosaic_0001>

<bundles_post_ra>
// kernel: tpu_custom_call.1
= control target key start
LH: loop header
LB: loop body
LE: loop exit
PB: predicated region body
PF: predicated region fallthrough
CT: control target
= control target key end

     0   :  { %6 = vsyncpa [#allocation3], 0  ;;  %s1392_s0 = inlined_call_operand.hbm [shape: f32[2,32,256], index: 0, kind: input, shape index: {}]   ;;  %s1393_s1 = inlined_call_operand.hbm [shape: f32[2,32,256], index: 1, kind: output, shape index: {}]  }
   0x1   :  { %8 = vsyncpa [#allocation3 + $0x1], 0 }
   0x2   :  { %9 = vsyncpa [#allocation4], 0 }
   0x3   :  { %11 = vsyncpa [#allocation4 + $0x1], 0  ;;  %s1213_s6 = smov 0   ;;  %s1215_s7 = smov 0  }
   0x4   :  { %s1217_s8 = smov 0   ;;  %s1219_s9 = smov 0  }
   0x5   :  { %s1221_s10 = smov 0   ;;  %s1223_s11 = smov 0  }
   0x6 LB: > { %s800_s12 = sadd.s32 4294967295, %s1195_s11   ;;  %s801_s13 = sadd.s32 4294967294, %s1195_s11   ;;  %s1195_s11 = sphi %s1223_s11, %s17_s11   ;;  %s1191_s10 = sphi %s1221_s10, %s1408_s10   ;;  %s1187_s9 = sphi %s1219_s9, %s1407_s9   ;;  %s1183_s8 = sphi %s1217_s8, %s1406_s8   ;;  %s1179_s7 = sphi %s1215_s7, %s1405_s7   ;;  %s1175_s6 = sphi %s1213_s6, %s1404_s6  }
   0x7   : > { %s29_s14 = sadd.s32 1, %s1191_s10  ;;  %s38_s15 = sadd.s32 1, %s1183_s8 }
   0x8   : > { %p31_p0 = scmp.ge.s32.totalorder %s29_s14, 2  ;;  %p45_p1 = scmp.ne.s32.totalorder %s1183_s8, %s1179_s7 }
   0x9   : > { %p46_p2 = scmp.eq.s32.totalorder %s1195_s11, 0  ;;  %p51_p3 = scmp.ne.s32.totalorder %s1179_s7, %s1175_s6 }
   0xa   : > { %s1410_s14 = smov (%p31_p0, %s29_s14), 0  ;;  %p52_p5 = scmp.eq.s32.totalorder %s800_s12, 0 }
   0xb   : > { %p1254_p4 = por %p46_p2, %p45_p1  ;;  %s33_s17 = ssub.s32 %s1191_s10, %s1410_s14 }
   0xc   : > { %p77_p6 = scmp.eq.s32.totalorder %s800_s12, 1  ;;  %p36_p7 = scmp.eq.s32.totalorder %s33_s17, 0 }
   0xd   : > { %p1260_p8 = por %p52_p5, %p51_p3  ;;  %p83_p10 = scmp.eq.s32.totalorder %s801_s13, 1 }
   0xe   : > { %p1264_p9 = por %p77_p6, %p45_p1  ;;  %p829_p13 = scmp.lt.s32.totalorder %s1195_s11, 2 }
   0xf   : > { %s1269_s20 = scalar_select %p36_p7, %s1183_s8, %s38_s15  }
  0x10   : > { %s1397_s19 = scalar_select %p1264_p9, 1, 0 }
  0x11   : > { %p1271_p11 = por %p83_p10, %p51_p3  ;;  %s103_s22 = sand.u32 1, %s1183_s8  }
  0x12   : > { %s804_s23 = sshll.u32 %s103_s22, 6  ;;  %s815_s24 = sshll.u32 %s1191_s10, 10 }
  0x13   : > { %s1398_s21 = scalar_select %p1271_p11, 1, 0 }
  0x14   : > { %s1282_s27 = scalar_lea.hbm %s1392_s0, %s815_s24  ;;  %s107_s28 = scalar_lea.vmem [#allocation2], %s804_s23 }
  0x15   : > { %s116_s29 = sshll.u32 %s107_s28, 4  ;;  %p1288_p0 = pnand %p829_p13, %p1254_p4  ;;  %s1284_s29 = int_to_ptr.vmem [resolvable:$true] %s116_s29 }
  0x16   : > { %s1293_s2 = scalar_lea.sflag [#allocation3], %s103_s22  ;;  %s1083_s3 = scalar_lea.hbm %s1282_s27, 1024 }
  0x17   : > { %p1084_p2 = scmp.ne.s32.totalorder %s1282_s27, %s1083_s3  ;;  %p1085_p3 = pneg %p1288_p0 }
  0x18   : > { %s1088_s12 = scalar_lea.hbm %s1392_s0, 2048  ;;  %p1089_p4 = scmp.lt.u32.totalorder %s1282_s27, %s1392_s0 }
  0x19   : > { %p1086_p5 = pnand %p1085_p3, %p1084_p2  ;;  %p1090_p7 = scmp.lt.u32.totalorder %s1088_s12, %s1083_s3 }
  0x1a   : > { %p1092_p13 = scmp.lt.u32.totalorder %s1083_s3, %s1282_s27 }
  0x1b   : > { %p1087_p6 = pneg %p1086_p5  ;;  %p1091_p10 = por %p1090_p7, %p1089_p4 }
  0x1d   : > { %p1093_p12 = por %p1092_p13, %p1091_p10 }
  0x1f   : > { %p1094_p1 = pnand %p1093_p12, %p1087_p6 }
  0x21   : > { %1097 = shalt.err (!%p1094_p1)
}
  0x22   : > { %s1098_s16 = scalar_lea.vmem %s1284_s29, 1024  ;;  %s1197_s17 = smov [#allocation2]  }
  0x23   : > { %p1099_p2 = scmp.ne.s32.totalorder %s1284_s29, %s1098_s16  ;;  %s1103_s22 = sshll.u32 %s1197_s17, 4  ;;  %s1104_s22 = int_to_ptr.vmem [resolvable:$false] %s1103_s22 }
  0x24   : > { %s1105_s23 = scalar_lea.vmem %s1104_s22, 2048  ;;  %p1106_p9 = scmp.lt.s32.totalorder %s1284_s29, %s1104_s22 }
  0x25   : > { %p1101_p5 = pnand %p1099_p2, %p1085_p3  ;;  %p1107_p4 = scmp.lt.s32.totalorder %s1105_s23, %s1098_s16 }
  0x27   : > { %p1102_p11 = pneg %p1101_p5  ;;  %p1108_p7 = por %p1107_p4, %p1106_p9 }
  0x29   : > { %p1109_p10 = pnand %p1108_p7, %p1102_p11 }
  0x2b   : > { %1112 = shalt.err (!%p1109_p10)
}
  0x2c   : > { %s1198_s24 = smov 256   ;;  %s1199_s25 = smov 16  }
  0x2d   : > { %824 = dma.hbm_to_vmem [thread:$0]  (!%p1288_p0), %s1282_s27, 1024, %s1284_s29, %s1293_s2, %s1198_s24, %s1198_s24, %s1199_s25  }
  0x2e   : > { %p124_p12 = scmp.lt.s32.totalorder %s1195_s11, 3  ;;  %p1400_p1 = scmp.ge.s32.totalorder %s1195_s11, 1 }
  0x30   : > { %p125_p3 = pnand %p1400_p1, %p124_p12 }
  0x31   : > { %s1325_s26 = sand.u32 (!%p125_p3), 1, %s1179_s7  }
  0x32   : > { %128 = sbr.rel (%p125_p3) target bundleno = 609 (0x261), region = 24  ;;  %s808_s28 = sshll.u32 (!%p125_p3), %s1325_s26, 6 }
  0x33   : > { %s131_s3 = scalar_lea.sflag (!%p125_p3), [#allocation3], %s1325_s26  ;;  %s134_s4 = scalar_lea.vmem (!%p125_p3), [#allocation2], %s808_s28 }
  0x39   : > { %1166 = dma.done.wait (%p1260_p8), %s131_s3, 1024  }
  0x3a   : > { %1168 = vsyncadd (%p1260_p8), %s131_s3, 4294966272  ;;  %v155_v0 = vld [vmem:[%s134_s4] sm:$0xff]  ;;  %v157_v1 = vld [vmem:[%s134_s4 + $0x10] sm:$0xff]  ;;  %s152_s18 = scalar_lea.vmem [#allocation5], %s808_s28  ;;  %s816_s29 = sshll.u32 %s1187_s9, 10 }
  0x3b   : > { %v159_v2 = vld [vmem:[%s134_s4 + $0x20] sm:$0xff]  ;;  %v161_v3 = vld [vmem:[%s134_s4 + $0x30] sm:$0xff]  ;;  %v156_v5 = vld [vmem:[%s134_s4 + $0x8] sm:$0xff]  ;;  %s713_s27 = sshll.u32 %s152_s18, 4  ;;  %s1343_s5 = scalar_lea.hbm %s1393_s1, %s816_s29  ;;  %s1338_s27 = int_to_ptr.vmem [resolvable:$true] %s713_s27 }
  0x3c   : > { %v163_v4 = vmax.f32 %v155_v0, %v159_v2  ;;  %v158_v6 = vld [vmem:[%s134_s4 + $0x18] sm:$0xff]  ;;  %v164_v7 = vmax.f32 %v157_v1, %v161_v3  ;;  %v160_v8 = vld [vmem:[%s134_s4 + $0x28] sm:$0xff]  ;;  %s698_s9 = scalar_lea.sflag [#allocation4], %s1325_s26  ;;  %s1113_s12 = scalar_lea.vmem %s1338_s27, 1024 }
  0x3d   : > { %v162_v9 = vld [vmem:[%s134_s4 + $0x38] sm:$0xff]  ;;  %v172_v10 = vmax.f32 %v156_v5, %v160_v8  ;;  %p1114_p8 = scmp.ne.s32.totalorder %s1338_s27, %s1113_s12  ;;  %p1401_p9 = scmp.ne.s32.totalorder %s1397_s19, 0 }
  0x3e   : > { %v173_v11 = vmax.f32 %v158_v6, %v162_v9  ;;  %v165_v12 = vmax.f32 %v163_v4, %v164_v7  ;;  %s1200_s13 = smov [#allocation5]  }
  0x3f   : > { %p1115_p11 = pnand %p1114_p8, %p1401_p9  ;;  %s1117_s15 = sshll.u32 %s1200_s13, 4  ;;  %s1118_s15 = int_to_ptr.vmem [resolvable:$false] %s1117_s15 }
  0x40   : > { %v174_v13 = vmax.f32 %v172_v10, %v173_v11  ;;  %v166_v14 = vrot.slane %v165_v12, 4  ;;  %s1119_s16 = scalar_lea.vmem %s1118_s15, 2048  ;;  %p1120_p6 = scmp.lt.s32.totalorder %s1338_s27, %s1118_s15 }
  0x41   : > { %p1116_p0 = pneg %p1115_p11  ;;  %p1121_p13 = scmp.lt.s32.totalorder %s1119_s16, %s1113_s12 }
  0x42   : > { %v175_v15 = vrot.slane %v174_v13, 4  ;;  %v167_v16 = vmax.f32 %v165_v12, %v166_v14 }
  0x43   : > { %p1122_p2 = por %p1121_p13, %p1120_p6 }
  0x44   : > { %v176_v17 = vmax.f32 %v174_v13, %v175_v15  ;;  %v168_v18 = vrot.slane %v167_v16, 2 }
  0x45   : > { %p1123_p5 = pnand %p1122_p2, %p1116_p0 }
  0x46   : > { %v177_v19 = vrot.slane %v176_v17, 2  ;;  %v169_v20 = vmax.f32 %v167_v16, %v168_v18 }
  0x48   : > { %v178_v21 = vmax.f32 %v176_v17, %v177_v19  ;;  %v170_v22 = vrot.slane %v169_v20, 1 }
  0x4a   : > { %v179_v23 = vrot.slane %v178_v21, 1  ;;  %v171_v24 = vmax.f32 %v169_v20, %v170_v22 }
  0x4c   : > { %v180_v25 = vmax.f32 %v178_v21, %v179_v23  ;;  %v181_v26 = vsub.f32 %v155_v0, %v171_v24  ;;  %v183_v27 = vsub.f32 %v157_v1, %v171_v24  ;;  %v185_v28 = vsub.f32 %v159_v2, %v171_v24 }
  0x4d   : > { %v187_v29 = vsub.f32 %v161_v3, %v171_v24 }
  0x4e   : > { %v182_v30 = vsub.f32 %v156_v5, %v180_v25  ;;  %v184_v31 = vsub.f32 %v158_v6, %v180_v25  ;;  %v189_v32 = vmul.f32 1.442695, %v181_v26  ;;  %v193_v33 = vmul.f32 1.442695, %v183_v27 }
  0x4f   : > { %v197_v34 = vmul.f32 1.442695, %v185_v28  ;;  %v186_v35 = vsub.f32 %v160_v8, %v180_v25  ;;  %v201_v36 = vmul.f32 1.442695, %v187_v29  ;;  %v188_v37 = vsub.f32 %v162_v9, %v180_v25 }
  0x50   : > { %883 = vpow2.f32 %v189_v32  ;;  %v191_v38 = vmul.f32 1.442695, %v182_v30  ;;  %v195_v39 = vmul.f32 1.442695, %v184_v31 }
  0x51   : > { %885 = vpow2.f32 %v193_v33  ;;  %v199_v40 = vmul.f32 1.442695, %v186_v35  ;;  %v203_v41 = vmul.f32 1.442695, %v188_v37 }
  0x52   : > { %887 = vpow2.f32 %v197_v34 }
  0x53   : > { %889 = vpow2.f32 %v201_v36 }
  0x54   : > { %891 = vpow2.f32 %v191_v38 }
  0x55   : > { %893 = vpow2.f32 %v195_v39 }
  0x56   : > { %895 = vpow2.f32 %v199_v40 }
  0x57   : > { %897 = vpow2.f32 %v203_v41 }
  0x5a   : > { %v884_v42 = vpop.eup %883 }
  0x5b   : > { %v886_v43 = vpop.eup %885 }
  0x5c   : > { %v888_v44 = vpop.eup %887  ;;  %v205_v45 = vadd.f32 %v886_v43, %v884_v42 }
  0x5d   : > { %v890_v46 = vpop.eup %889 }
  0x5e   : > { %v892_v47 = vpop.eup %891  ;;  %v206_v48 = vadd.f32 %v888_v44, %v205_v45 }
  0x5f   : > { %v894_v49 = vpop.eup %893 }
  0x60   : > { %v896_v50 = vpop.eup %895  ;;  %v207_v51 = vadd.f32 %v890_v46, %v206_v48  ;;  %v214_v52 = vadd.f32 %v894_v49, %v892_v47 }
  0x61   : > { %v898_v53 = vpop.eup %897 }
  0x62   : > { %v208_v54 = vrot.slane %v207_v51, 4  ;;  %v215_v55 = vadd.f32 %v896_v50, %v214_v52 }
  0x64   : > { %v209_v56 = vadd.f32 %v208_v54, %v207_v51  ;;  %v216_v57 = vadd.f32 %v898_v53, %v215_v55 }
  0x66   : > { %v210_v58 = vrot.slane %v209_v56, 2  ;;  %v217_v59 = vrot.slane %v216_v57, 4 }
  0x68   : > { %v211_v60 = vadd.f32 %v210_v58, %v209_v56  ;;  %v218_v61 = vadd.f32 %v217_v59, %v216_v57 }
  0x6a   : > { %v212_v62 = vrot.slane %v211_v60, 1  ;;  %v219_v63 = vrot.slane %v218_v61, 2 }
  0x6c   : > { %v213_v0 = vadd.f32 %v212_v62, %v211_v60  ;;  %v220_v1 = vadd.f32 %v219_v63, %v218_v61 }
  0x6e   : > { %899 = vrcp.f32 %v213_v0  ;;  %v221_v2 = vrot.slane %v220_v1, 1 }
  0x70   : > { %v222_v3 = vadd.f32 %v221_v2, %v220_v1 }
  0x72   : > { %901 = vrcp.f32 %v222_v3 }
  0x78   : > { %v900_v4 = vpop.eup %899 }
  0x79   : > { %v225_v5 = vmul.f32 %v900_v4, %v213_v0 }
  0x7b   : > { %v227_v6 = vsub.f32 2.0, %v225_v5 }
  0x7c   : > { %v902_v7 = vpop.eup %901 }
  0x7d   : > { %v229_v8 = vmul.f32 %v900_v4, %v227_v6  ;;  %v226_v9 = vmul.f32 %v902_v7, %v222_v3 }
  0x7f   : > { %v231_v10 = vmul.f32 %v884_v42, %v229_v8  ;;  %v233_v11 = vmul.f32 %v886_v43, %v229_v8  ;;  %v235_v12 = vmul.f32 %v888_v44, %v229_v8  ;;  %v237_v13 = vmul.f32 %v890_v46, %v229_v8 }
  0x80   : > { %v228_v14 = vsub.f32 2.0, %v226_v9 }
  0x81   : > { %v239_v15 = vmul.f32 1.442695, %v231_v10  ;;  %v243_v16 = vmul.f32 1.442695, %v233_v11  ;;  %v247_v17 = vmul.f32 1.442695, %v235_v12 }
  0x82   : > { %v251_v18 = vmul.f32 1.442695, %v237_v13  ;;  %v230_v19 = vmul.f32 %v902_v7, %v228_v14 }
  0x83   : > { %903 = vpow2.f32 %v239_v15 }
  0x84   : > { %905 = vpow2.f32 %v243_v16  ;;  %v232_v20 = vmul.f32 %v892_v47, %v230_v19  ;;  %v234_v21 = vmul.f32 %v894_v49, %v230_v19  ;;  %v236_v22 = vmul.f32 %v896_v50, %v230_v19 }
  0x85   : > { %907 = vpow2.f32 %v247_v17  ;;  %v238_v23 = vmul.f32 %v898_v53, %v230_v19 }
  0x86   : > { %909 = vpow2.f32 %v251_v18  ;;  %v241_v24 = vmul.f32 1.442695, %v232_v20  ;;  %v245_v25 = vmul.f32 1.442695, %v234_v21  ;;  %v249_v26 = vmul.f32 1.442695, %v236_v22 }
  0x87   : > { %v253_v27 = vmul.f32 1.442695, %v238_v23 }
  0x88   : > { %911 = vpow2.f32 %v241_v24 }
  0x89   : > { %913 = vpow2.f32 %v245_v25 }
  0x8a   : > { %915 = vpow2.f32 %v249_v26 }
  0x8b   : > { %917 = vpow2.f32 %v253_v27 }
  0x8d   : > { %v904_v28 = vpop.eup %903 }
  0x8e   : > { %v906_v29 = vpop.eup %905 }
  0x8f   : > { %v908_v30 = vpop.eup %907  ;;  %v255_v31 = vadd.f32 %v906_v29, %v904_v28 }
  0x90   : > { %v910_v32 = vpop.eup %909 }
  0x91   : > { %v256_v33 = vadd.f32 %v908_v30, %v255_v31 }
  0x92   : > { %v912_v34 = vpop.eup %911 }
  0x93   : > { %v914_v35 = vpop.eup %913  ;;  %v257_v36 = vadd.f32 %v910_v32, %v256_v33 }
  0x94   : > { %v916_v37 = vpop.eup %915  ;;  %v264_v38 = vadd.f32 %v914_v35, %v912_v34 }
  0x95   : > { %v918_v39 = vpop.eup %917  ;;  %v258_v40 = vrot.slane %v257_v36, 4 }
  0x96   : > { %v265_v41 = vadd.f32 %v916_v37, %v264_v38 }
  0x97   : > { %v259_v42 = vadd.f32 %v258_v40, %v257_v36 }
  0x98   : > { %v266_v43 = vadd.f32 %v918_v39, %v265_v41 }
  0x99   : > { %v260_v44 = vrot.slane %v259_v42, 2 }
  0x9a   : > { %v267_v45 = vrot.slane %v266_v43, 4 }
  0x9b   : > { %v261_v46 = vadd.f32 %v260_v44, %v259_v42 }
  0x9c   : > { %v268_v47 = vadd.f32 %v267_v45, %v266_v43 }
  0x9d   : > { %v262_v48 = vrot.slane %v261_v46, 1 }
  0x9e   : > { %v269_v49 = vrot.slane %v268_v47, 2 }
  0x9f   : > { %v263_v50 = vadd.f32 %v262_v48, %v261_v46 }
  0xa0   : > { %v270_v51 = vadd.f32 %v269_v49, %v268_v47 }
  0xa1   : > { %919 = vrcp.f32 %v263_v50 }
  0xa2   : > { %v271_v52 = vrot.slane %v270_v51, 1 }
  0xa4   : > { %v272_v53 = vadd.f32 %v271_v52, %v270_v51 }
  0xa6   : > { %921 = vrcp.f32 %v272_v53 }
  0xab   : > { %v920_v54 = vpop.eup %919 }
  0xac   : > { %v275_v55 = vmul.f32 %v920_v54, %v263_v50 }
  0xae   : > { %v277_v56 = vsub.f32 2.0, %v275_v55 }
  0xb0   : > { %v922_v57 = vpop.eup %921  ;;  %v279_v58 = vmul.f32 %v920_v54, %v277_v56 }
  0xb1   : > { %v276_v59 = vmul.f32 %v922_v57, %v272_v53 }
  0xb2   : > { %v281_v60 = vmul.f32 %v904_v28, %v279_v58  ;;  %v283_v61 = vmul.f32 %v906_v29, %v279_v58  ;;  %v285_v62 = vmul.f32 %v908_v30, %v279_v58  ;;  %v287_v63 = vmul.f32 %v910_v32, %v279_v58 }
  0xb3   : > { %v278_v0 = vsub.f32 2.0, %v276_v59 }
  0xb4   : > { %v289_v1 = vmul.f32 1.442695, %v281_v60  ;;  %v293_v2 = vmul.f32 1.442695, %v283_v61  ;;  %v297_v3 = vmul.f32 1.442695, %v285_v62 }
  0xb5   : > { %v301_v4 = vmul.f32 1.442695, %v287_v63  ;;  %v280_v5 = vmul.f32 %v922_v57, %v278_v0 }
  0xb6   : > { %923 = vpow2.f32 %v289_v1 }
  0xb7   : > { %925 = vpow2.f32 %v293_v2  ;;  %v282_v6 = vmul.f32 %v912_v34, %v280_v5  ;;  %v284_v7 = vmul.f32 %v914_v35, %v280_v5  ;;  %v286_v8 = vmul.f32 %v916_v37, %v280_v5 }
  0xb8   : > { %927 = vpow2.f32 %v297_v3  ;;  %v288_v9 = vmul.f32 %v918_v39, %v280_v5 }
  0xb9   : > { %929 = vpow2.f32 %v301_v4  ;;  %v291_v10 = vmul.f32 1.442695, %v282_v6  ;;  %v295_v11 = vmul.f32 1.442695, %v284_v7  ;;  %v299_v12 = vmul.f32 1.442695, %v286_v8 }
  0xba   : > { %v303_v13 = vmul.f32 1.442695, %v288_v9 }
  0xbb   : > { %931 = vpow2.f32 %v291_v10 }
  0xbc   : > { %933 = vpow2.f32 %v295_v11 }
  0xbd   : > { %935 = vpow2.f32 %v299_v12 }
  0xbe   : > { %937 = vpow2.f32 %v303_v13 }
  0xc0   : > { %v924_v14 = vpop.eup %923 }
  0xc1   : > { %v926_v15 = vpop.eup %925 }
  0xc2   : > { %v928_v16 = vpop.eup %927  ;;  %v305_v17 = vadd.f32 %v926_v15, %v924_v14 }
  0xc3   : > { %v930_v18 = vpop.eup %929 }
  0xc4   : > { %v306_v19 = vadd.f32 %v928_v16, %v305_v17 }
  0xc5   : > { %v932_v20 = vpop.eup %931 }
  0xc6   : > { %v934_v21 = vpop.eup %933  ;;  %v307_v22 = vadd.f32 %v930_v18, %v306_v19 }
  0xc7   : > { %v936_v23 = vpop.eup %935  ;;  %v314_v24 = vadd.f32 %v934_v21, %v932_v20 }
  0xc8   : > { %v938_v25 = vpop.eup %937  ;;  %v308_v26 = vrot.slane %v307_v22, 4 }
  0xc9   : > { %v315_v27 = vadd.f32 %v936_v23, %v314_v24 }
  0xca   : > { %v309_v28 = vadd.f32 %v308_v26, %v307_v22 }
  0xcb   : > { %v316_v29 = vadd.f32 %v938_v25, %v315_v27 }
  0xcc   : > { %v310_v30 = vrot.slane %v309_v28, 2 }
  0xcd   : > { %v317_v31 = vrot.slane %v316_v29, 4 }
  0xce   : > { %v311_v32 = vadd.f32 %v310_v30, %v309_v28 }
  0xcf   : > { %v318_v33 = vadd.f32 %v317_v31, %v316_v29 }
  0xd0   : > { %v312_v34 = vrot.slane %v311_v32, 1 }
  0xd1   : > { %v319_v35 = vrot.slane %v318_v33, 2 }
  0xd2   : > { %v313_v36 = vadd.f32 %v312_v34, %v311_v32 }
  0xd3   : > { %v320_v37 = vadd.f32 %v319_v35, %v318_v33 }
  0xd4   : > { %939 = vrcp.f32 %v313_v36 }
  0xd5   : > { %v321_v38 = vrot.slane %v320_v37, 1 }
  0xd7   : > { %v322_v39 = vadd.f32 %v321_v38, %v320_v37 }
  0xd9   : > { %941 = vrcp.f32 %v322_v39 }
  0xde   : > { %v940_v40 = vpop.eup %939 }
  0xdf   : > { %v325_v41 = vmul.f32 %v940_v40, %v313_v36 }
  0xe1   : > { %v327_v42 = vsub.f32 2.0, %v325_v41 }
  0xe3   : > { %v942_v43 = vpop.eup %941  ;;  %v329_v44 = vmul.f32 %v940_v40, %v327_v42 }
  0xe4   : > { %v326_v45 = vmul.f32 %v942_v43, %v322_v39 }
  0xe5   : > { %v331_v46 = vmul.f32 %v924_v14, %v329_v44  ;;  %v333_v47 = vmul.f32 %v926_v15, %v329_v44  ;;  %v335_v48 = vmul.f32 %v928_v16, %v329_v44  ;;  %v337_v49 = vmul.f32 %v930_v18, %v329_v44 }
  0xe6   : > { %v328_v50 = vsub.f32 2.0, %v326_v45 }
  0xe7   : > { %v339_v51 = vmul.f32 1.442695, %v331_v46  ;;  %v343_v52 = vmul.f32 1.442695, %v333_v47  ;;  %v347_v53 = vmul.f32 1.442695, %v335_v48 }
  0xe8   : > { %v351_v54 = vmul.f32 1.442695, %v337_v49  ;;  %v330_v55 = vmul.f32 %v942_v43, %v328_v50 }
  0xe9   : > { %943 = vpow2.f32 %v339_v51 }
  0xea   : > { %945 = vpow2.f32 %v343_v52  ;;  %v332_v56 = vmul.f32 %v932_v20, %v330_v55  ;;  %v334_v57 = vmul.f32 %v934_v21, %v330_v55  ;;  %v336_v58 = vmul.f32 %v936_v23, %v330_v55 }
  0xeb   : > { %947 = vpow2.f32 %v347_v53  ;;  %v338_v59 = vmul.f32 %v938_v25, %v330_v55 }
  0xec   : > { %949 = vpow2.f32 %v351_v54  ;;  %v341_v60 = vmul.f32 1.442695, %v332_v56  ;;  %v345_v61 = vmul.f32 1.442695, %v334_v57  ;;  %v349_v62 = vmul.f32 1.442695, %v336_v58 }
  0xed   : > { %v353_v63 = vmul.f32 1.442695, %v338_v59 }
  0xee   : > { %951 = vpow2.f32 %v341_v60 }
  0xef   : > { %953 = vpow2.f32 %v345_v61 }
  0xf0   : > { %955 = vpow2.f32 %v349_v62 }
  0xf1   : > { %957 = vpow2.f32 %v353_v63 }
  0xf3   : > { %v944_v0 = vpop.eup %943 }
  0xf4   : > { %v946_v1 = vpop.eup %945 }
  0xf5   : > { %v948_v2 = vpop.eup %947  ;;  %v355_v3 = vadd.f32 %v946_v1, %v944_v0 }
  0xf6   : > { %v950_v4 = vpop.eup %949 }
  0xf7   : > { %v356_v5 = vadd.f32 %v948_v2, %v355_v3 }
  0xf8   : > { %v952_v6 = vpop.eup %951 }
  0xf9   : > { %v954_v7 = vpop.eup %953  ;;  %v357_v8 = vadd.f32 %v950_v4, %v356_v5 }
  0xfa   : > { %v956_v9 = vpop.eup %955  ;;  %v364_v10 = vadd.f32 %v954_v7, %v952_v6 }
  0xfb   : > { %v958_v11 = vpop.eup %957  ;;  %v358_v12 = vrot.slane %v357_v8, 4 }
  0xfc   : > { %v365_v13 = vadd.f32 %v956_v9, %v364_v10 }
  0xfd   : > { %v359_v14 = vadd.f32 %v358_v12, %v357_v8 }
  0xfe   : > { %v366_v15 = vadd.f32 %v958_v11, %v365_v13 }
  0xff   : > { %v360_v16 = vrot.slane %v359_v14, 2 }
 0x100   : > { %v367_v17 = vrot.slane %v366_v15, 4 }
 0x101   : > { %v361_v18 = vadd.f32 %v360_v16, %v359_v14 }
 0x102   : > { %v368_v19 = vadd.f32 %v367_v17, %v366_v15 }
 0x103   : > { %v362_v20 = vrot.slane %v361_v18, 1 }
 0x104   : > { %v369_v21 = vrot.slane %v368_v19, 2 }
 0x105   : > { %v363_v22 = vadd.f32 %v362_v20, %v361_v18 }
 0x106   : > { %v370_v23 = vadd.f32 %v369_v21, %v368_v19 }
 0x107   : > { %959 = vrcp.f32 %v363_v22 }
 0x108   : > { %v371_v24 = vrot.slane %v370_v23, 1 }
 0x10a   : > { %v372_v25 = vadd.f32 %v371_v24, %v370_v23 }
 0x10c   : > { %961 = vrcp.f32 %v372_v25 }
 0x111   : > { %v960_v26 = vpop.eup %959 }
 0x112   : > { %v375_v27 = vmul.f32 %v960_v26, %v363_v22 }
 0x114   : > { %v377_v28 = vsub.f32 2.0, %v375_v27 }
 0x116   : > { %v962_v29 = vpop.eup %961  ;;  %v379_v30 = vmul.f32 %v960_v26, %v377_v28 }
 0x117   : > { %v376_v31 = vmul.f32 %v962_v29, %v372_v25 }
 0x118   : > { %v381_v32 = vmul.f32 %v944_v0, %v379_v30  ;;  %v383_v33 = vmul.f32 %v946_v1, %v379_v30  ;;  %v385_v34 = vmul.f32 %v948_v2, %v379_v30  ;;  %v387_v35 = vmul.f32 %v950_v4, %v379_v30 }
 0x119   : > { %v378_v36 = vsub.f32 2.0, %v376_v31 }
 0x11a   : > { %v389_v37 = vmul.f32 1.442695, %v381_v32  ;;  %v393_v38 = vmul.f32 1.442695, %v383_v33  ;;  %v397_v39 = vmul.f32 1.442695, %v385_v34 }
 0x11b   : > { %v401_v40 = vmul.f32 1.442695, %v387_v35  ;;  %v380_v41 = vmul.f32 %v962_v29, %v378_v36 }
 0x11c   : > { %963 = vpow2.f32 %v389_v37 }
 0x11d   : > { %965 = vpow2.f32 %v393_v38  ;;  %v382_v42 = vmul.f32 %v952_v6, %v380_v41  ;;  %v384_v43 = vmul.f32 %v954_v7, %v380_v41  ;;  %v386_v44 = vmul.f32 %v956_v9, %v380_v41 }
 0x11e   : > { %967 = vpow2.f32 %v397_v39  ;;  %v388_v45 = vmul.f32 %v958_v11, %v380_v41 }
 0x11f   : > { %969 = vpow2.f32 %v401_v40  ;;  %v391_v46 = vmul.f32 1.442695, %v382_v42  ;;  %v395_v47 = vmul.f32 1.442695, %v384_v43  ;;  %v399_v48 = vmul.f32 1.442695, %v386_v44 }
 0x120   : > { %v403_v49 = vmul.f32 1.442695, %v388_v45 }
 0x121   : > { %971 = vpow2.f32 %v391_v46 }
 0x122   : > { %973 = vpow2.f32 %v395_v47 }
 0x123   : > { %975 = vpow2.f32 %v399_v48 }
 0x124   : > { %977 = vpow2.f32 %v403_v49 }
 0x126   : > { %v964_v50 = vpop.eup %963 }
 0x127   : > { %v966_v51 = vpop.eup %965 }
 0x128   : > { %v968_v52 = vpop.eup %967  ;;  %v405_v53 = vadd.f32 %v966_v51, %v964_v50 }
 0x129   : > { %v970_v54 = vpop.eup %969 }
 0x12a   : > { %v406_v55 = vadd.f32 %v968_v52, %v405_v53 }
 0x12b   : > { %v972_v56 = vpop.eup %971 }
 0x12c   : > { %v974_v57 = vpop.eup %973  ;;  %v407_v58 = vadd.f32 %v970_v54, %v406_v55 }
 0x12d   : > { %v976_v59 = vpop.eup %975  ;;  %v414_v60 = vadd.f32 %v974_v57, %v972_v56 }
 0x12e   : > { %v978_v61 = vpop.eup %977  ;;  %v408_v62 = vrot.slane %v407_v58, 4 }
 0x12f   : > { %v415_v63 = vadd.f32 %v976_v59, %v414_v60 }
 0x130   : > { %v409_v0 = vadd.f32 %v408_v62, %v407_v58 }
 0x131   : > { %v416_v1 = vadd.f32 %v978_v61, %v415_v63 }
 0x132   : > { %v410_v2 = vrot.slane %v409_v0, 2 }
 0x133   : > { %v417_v3 = vrot.slane %v416_v1, 4 }
 0x134   : > { %v411_v4 = vadd.f32 %v410_v2, %v409_v0 }
 0x135   : > { %v418_v5 = vadd.f32 %v417_v3, %v416_v1 }
 0x136   : > { %v412_v6 = vrot.slane %v411_v4, 1 }
 0x137   : > { %v419_v7 = vrot.slane %v418_v5, 2 }
 0x138   : > { %v413_v8 = vadd.f32 %v412_v6, %v411_v4 }
 0x139   : > { %v420_v9 = vadd.f32 %v419_v7, %v418_v5 }
 0x13a   : > { %979 = vrcp.f32 %v413_v8 }
 0x13b   : > { %v421_v10 = vrot.slane %v420_v9, 1 }
 0x13d   : > { %v422_v11 = vadd.f32 %v421_v10, %v420_v9 }
 0x13f   : > { %981 = vrcp.f32 %v422_v11 }
 0x144   : > { %v980_v12 = vpop.eup %979 }
 0x145   : > { %v425_v13 = vmul.f32 %v980_v12, %v413_v8 }
 0x147   : > { %v427_v14 = vsub.f32 2.0, %v425_v13 }
 0x149   : > { %v982_v15 = vpop.eup %981  ;;  %v429_v16 = vmul.f32 %v980_v12, %v427_v14 }
 0x14a   : > { %v426_v17 = vmul.f32 %v982_v15, %v422_v11 }
 0x14b   : > { %v431_v18 = vmul.f32 %v964_v50, %v429_v16  ;;  %v433_v19 = vmul.f32 %v966_v51, %v429_v16  ;;  %v435_v20 = vmul.f32 %v968_v52, %v429_v16  ;;  %v437_v21 = vmul.f32 %v970_v54, %v429_v16 }
 0x14c   : > { %v428_v22 = vsub.f32 2.0, %v426_v17 }
 0x14d   : > { %v439_v23 = vmul.f32 1.442695, %v431_v18  ;;  %v443_v24 = vmul.f32 1.442695, %v433_v19  ;;  %v447_v25 = vmul.f32 1.442695, %v435_v20 }
 0x14e   : > { %v451_v26 = vmul.f32 1.442695, %v437_v21  ;;  %v430_v27 = vmul.f32 %v982_v15, %v428_v22 }
 0x14f   : > { %983 = vpow2.f32 %v439_v23 }
 0x150   : > { %985 = vpow2.f32 %v443_v24  ;;  %v432_v28 = vmul.f32 %v972_v56, %v430_v27  ;;  %v434_v29 = vmul.f32 %v974_v57, %v430_v27  ;;  %v436_v30 = vmul.f32 %v976_v59, %v430_v27 }
 0x151   : > { %987 = vpow2.f32 %v447_v25  ;;  %v438_v31 = vmul.f32 %v978_v61, %v430_v27 }
 0x152   : > { %989 = vpow2.f32 %v451_v26  ;;  %v441_v32 = vmul.f32 1.442695, %v432_v28  ;;  %v445_v33 = vmul.f32 1.442695, %v434_v29  ;;  %v449_v34 = vmul.f32 1.442695, %v436_v30 }
 0x153   : > { %v453_v35 = vmul.f32 1.442695, %v438_v31 }
 0x154   : > { %991 = vpow2.f32 %v441_v32 }
 0x155   : > { %993 = vpow2.f32 %v445_v33 }
 0x156   : > { %995 = vpow2.f32 %v449_v34 }
 0x157   : > { %997 = vpow2.f32 %v453_v35 }
 0x159   : > { %v984_v36 = vpop.eup %983 }
 0x15a   : > { %v986_v37 = vpop.eup %985 }
 0x15b   : > { %v988_v38 = vpop.eup %987  ;;  %v455_v39 = vadd.f32 %v986_v37, %v984_v36 }
 0x15c   : > { %v990_v40 = vpop.eup %989 }
 0x15d   : > { %v456_v41 = vadd.f32 %v988_v38, %v455_v39 }
 0x15e   : > { %v992_v42 = vpop.eup %991 }
 0x15f   : > { %v994_v43 = vpop.eup %993  ;;  %v457_v44 = vadd.f32 %v990_v40, %v456_v41 }
 0x160   : > { %v996_v45 = vpop.eup %995  ;;  %v464_v46 = vadd.f32 %v994_v43, %v992_v42 }
 0x161   : > { %v998_v47 = vpop.eup %997  ;;  %v458_v48 = vrot.slane %v457_v44, 4 }
 0x162   : > { %v465_v49 = vadd.f32 %v996_v45, %v464_v46 }
 0x163   : > { %v459_v50 = vadd.f32 %v458_v48, %v457_v44 }
 0x164   : > { %v466_v51 = vadd.f32 %v998_v47, %v465_v49 }
 0x165   : > { %v460_v52 = vrot.slane %v459_v50, 2 }
 0x166   : > { %v467_v53 = vrot.slane %v466_v51, 4 }
 0x167   : > { %v461_v54 = vadd.f32 %v460_v52, %v459_v50 }
 0x168   : > { %v468_v55 = vadd.f32 %v467_v53, %v466_v51 }
 0x169   : > { %v462_v56 = vrot.slane %v461_v54, 1 }
 0x16a   : > { %v469_v57 = vrot.slane %v468_v55, 2 }
 0x16b   : > { %v463_v58 = vadd.f32 %v462_v56, %v461_v54 }
 0x16c   : > { %v470_v59 = vadd.f32 %v469_v57, %v468_v55 }
 0x16d   : > { %999 = vrcp.f32 %v463_v58 }
 0x16e   : > { %v471_v60 = vrot.slane %v470_v59, 1 }
 0x170   : > { %v472_v61 = vadd.f32 %v471_v60, %v470_v59 }
 0x172   : > { %1001 = vrcp.f32 %v472_v61 }
 0x177   : > { %v1000_v62 = vpop.eup %999 }
 0x178   : > { %v475_v63 = vmul.f32 %v1000_v62, %v463_v58 }
 0x17a   : > { %v477_v0 = vsub.f32 2.0, %v475_v63 }
 0x17c   : > { %v1002_v1 = vpop.eup %1001  ;;  %v479_v2 = vmul.f32 %v1000_v62, %v477_v0 }
 0x17d   : > { %v476_v3 = vmul.f32 %v1002_v1, %v472_v61 }
 0x17e   : > { %v481_v4 = vmul.f32 %v984_v36, %v479_v2  ;;  %v483_v5 = vmul.f32 %v986_v37, %v479_v2  ;;  %v485_v6 = vmul.f32 %v988_v38, %v479_v2  ;;  %v487_v7 = vmul.f32 %v990_v40, %v479_v2 }
 0x17f   : > { %v478_v8 = vsub.f32 2.0, %v476_v3 }
 0x180   : > { %v489_v9 = vmul.f32 1.442695, %v481_v4  ;;  %v493_v10 = vmul.f32 1.442695, %v483_v5  ;;  %v497_v11 = vmul.f32 1.442695, %v485_v6 }
 0x181   : > { %v501_v12 = vmul.f32 1.442695, %v487_v7  ;;  %v480_v13 = vmul.f32 %v1002_v1, %v478_v8 }
 0x182   : > { %1003 = vpow2.f32 %v489_v9 }
 0x183   : > { %1005 = vpow2.f32 %v493_v10  ;;  %v482_v14 = vmul.f32 %v992_v42, %v480_v13  ;;  %v484_v15 = vmul.f32 %v994_v43, %v480_v13  ;;  %v486_v16 = vmul.f32 %v996_v45, %v480_v13 }
 0x184   : > { %1007 = vpow2.f32 %v497_v11  ;;  %v488_v17 = vmul.f32 %v998_v47, %v480_v13 }
 0x185   : > { %1009 = vpow2.f32 %v501_v12  ;;  %v491_v18 = vmul.f32 1.442695, %v482_v14  ;;  %v495_v19 = vmul.f32 1.442695, %v484_v15  ;;  %v499_v20 = vmul.f32 1.442695, %v486_v16 }
 0x186   : > { %v503_v21 = vmul.f32 1.442695, %v488_v17 }
 0x187   : > { %1011 = vpow2.f32 %v491_v18 }
 0x188   : > { %1013 = vpow2.f32 %v495_v19 }
 0x189   : > { %1015 = vpow2.f32 %v499_v20 }
 0x18a   : > { %1017 = vpow2.f32 %v503_v21 }
 0x18c   : > { %v1004_v22 = vpop.eup %1003 }
 0x18d   : > { %v1006_v23 = vpop.eup %1005 }
 0x18e   : > { %v1008_v24 = vpop.eup %1007  ;;  %v505_v25 = vadd.f32 %v1006_v23, %v1004_v22 }
 0x18f   : > { %v1010_v26 = vpop.eup %1009 }
 0x190   : > { %v506_v27 = vadd.f32 %v1008_v24, %v505_v25 }
 0x191   : > { %v1012_v28 = vpop.eup %1011 }
 0x192   : > { %v1014_v29 = vpop.eup %1013  ;;  %v507_v30 = vadd.f32 %v1010_v26, %v506_v27 }
 0x193   : > { %v1016_v31 = vpop.eup %1015  ;;  %v514_v32 = vadd.f32 %v1014_v29, %v1012_v28 }
 0x194   : > { %v1018_v33 = vpop.eup %1017  ;;  %v508_v34 = vrot.slane %v507_v30, 4 }
 0x195   : > { %v515_v35 = vadd.f32 %v1016_v31, %v514_v32 }
 0x196   : > { %v509_v36 = vadd.f32 %v508_v34, %v507_v30 }
 0x197   : > { %v516_v37 = vadd.f32 %v1018_v33, %v515_v35 }
 0x198   : > { %v510_v38 = vrot.slane %v509_v36, 2 }
 0x199   : > { %v517_v39 = vrot.slane %v516_v37, 4 }
 0x19a   : > { %v511_v40 = vadd.f32 %v510_v38, %v509_v36 }
 0x19b   : > { %v518_v41 = vadd.f32 %v517_v39, %v516_v37 }
 0x19c   : > { %v512_v42 = vrot.slane %v511_v40, 1 }
 0x19d   : > { %v519_v43 = vrot.slane %v518_v41, 2 }
 0x19e   : > { %v513_v44 = vadd.f32 %v512_v42, %v511_v40 }
 0x19f   : > { %v520_v45 = vadd.f32 %v519_v43, %v518_v41 }
 0x1a0   : > { %1019 = vrcp.f32 %v513_v44 }
 0x1a1   : > { %v521_v46 = vrot.slane %v520_v45, 1 }
 0x1a3   : > { %v522_v47 = vadd.f32 %v521_v46, %v520_v45 }
 0x1a5   : > { %1021 = vrcp.f32 %v522_v47 }
 0x1aa   : > { %v1020_v48 = vpop.eup %1019 }
 0x1ab   : > { %v525_v49 = vmul.f32 %v1020_v48, %v513_v44 }
 0x1ad   : > { %v527_v50 = vsub.f32 2.0, %v525_v49 }
 0x1af   : > { %v1022_v51 = vpop.eup %1021  ;;  %v529_v52 = vmul.f32 %v1020_v48, %v527_v50 }
 0x1b0   : > { %v526_v53 = vmul.f32 %v1022_v51, %v522_v47 }
 0x1b1   : > { %v531_v54 = vmul.f32 %v1004_v22, %v529_v52  ;;  %v533_v55 = vmul.f32 %v1006_v23, %v529_v52  ;;  %v535_v56 = vmul.f32 %v1008_v24, %v529_v52  ;;  %v537_v57 = vmul.f32 %v1010_v26, %v529_v52 }
 0x1b2   : > { %v528_v58 = vsub.f32 2.0, %v526_v53 }
 0x1b3   : > { %v539_v59 = vmul.f32 1.442695, %v531_v54  ;;  %v543_v60 = vmul.f32 1.442695, %v533_v55  ;;  %v547_v61 = vmul.f32 1.442695, %v535_v56 }
 0x1b4   : > { %v551_v62 = vmul.f32 1.442695, %v537_v57  ;;  %v530_v63 = vmul.f32 %v1022_v51, %v528_v58 }
 0x1b5   : > { %1023 = vpow2.f32 %v539_v59 }
 0x1b6   : > { %1025 = vpow2.f32 %v543_v60  ;;  %v532_v0 = vmul.f32 %v1012_v28, %v530_v63  ;;  %v534_v1 = vmul.f32 %v1014_v29, %v530_v63  ;;  %v536_v2 = vmul.f32 %v1016_v31, %v530_v63 }
 0x1b7   : > { %1027 = vpow2.f32 %v547_v61  ;;  %v538_v3 = vmul.f32 %v1018_v33, %v530_v63 }
 0x1b8   : > { %1029 = vpow2.f32 %v551_v62  ;;  %v541_v4 = vmul.f32 1.442695, %v532_v0  ;;  %v545_v5 = vmul.f32 1.442695, %v534_v1  ;;  %v549_v6 = vmul.f32 1.442695, %v536_v2 }
 0x1b9   : > { %v553_v7 = vmul.f32 1.442695, %v538_v3 }
 0x1ba   : > { %1031 = vpow2.f32 %v541_v4 }
 0x1bb   : > { %1033 = vpow2.f32 %v545_v5 }
 0x1bc   : > { %1035 = vpow2.f32 %v549_v6 }
 0x1bd   : > { %1037 = vpow2.f32 %v553_v7 }
 0x1bf   : > { %v1024_v8 = vpop.eup %1023 }
 0x1c0   : > { %v1026_v9 = vpop.eup %1025 }
 0x1c1   : > { %v1028_v10 = vpop.eup %1027  ;;  %v555_v11 = vadd.f32 %v1026_v9, %v1024_v8 }
 0x1c2   : > { %v1030_v12 = vpop.eup %1029 }
 0x1c3   : > { %v556_v13 = vadd.f32 %v1028_v10, %v555_v11 }
 0x1c4   : > { %v1032_v14 = vpop.eup %1031 }
 0x1c5   : > { %v1034_v15 = vpop.eup %1033  ;;  %v557_v16 = vadd.f32 %v1030_v12, %v556_v13 }
 0x1c6   : > { %v1036_v17 = vpop.eup %1035  ;;  %v564_v18 = vadd.f32 %v1034_v15, %v1032_v14 }
 0x1c7   : > { %v1038_v19 = vpop.eup %1037  ;;  %v558_v20 = vrot.slane %v557_v16, 4 }
 0x1c8   : > { %v565_v21 = vadd.f32 %v1036_v17, %v564_v18 }
 0x1c9   : > { %v559_v22 = vadd.f32 %v558_v20, %v557_v16 }
 0x1ca   : > { %v566_v23 = vadd.f32 %v1038_v19, %v565_v21 }
 0x1cb   : > { %v560_v24 = vrot.slane %v559_v22, 2 }
 0x1cc   : > { %v567_v25 = vrot.slane %v566_v23, 4 }
 0x1cd   : > { %v561_v26 = vadd.f32 %v560_v24, %v559_v22 }
 0x1ce   : > { %v568_v27 = vadd.f32 %v567_v25, %v566_v23 }
 0x1cf   : > { %v562_v28 = vrot.slane %v561_v26, 1 }
 0x1d0   : > { %v569_v29 = vrot.slane %v568_v27, 2 }
 0x1d1   : > { %v563_v30 = vadd.f32 %v562_v28, %v561_v26 }
 0x1d2   : > { %v570_v31 = vadd.f32 %v569_v29, %v568_v27 }
 0x1d3   : > { %1039 = vrcp.f32 %v563_v30 }
 0x1d4   : > { %v571_v32 = vrot.slane %v570_v31, 1 }
 0x1d6   : > { %v572_v33 = vadd.f32 %v571_v32, %v570_v31 }
 0x1d8   : > { %1041 = vrcp.f32 %v572_v33 }
 0x1dd   : > { %v1040_v34 = vpop.eup %1039 }
 0x1de   : > { %v575_v35 = vmul.f32 %v1040_v34, %v563_v30 }
 0x1e0   : > { %v577_v36 = vsub.f32 2.0, %v575_v35 }
 0x1e2   : > { %v1042_v37 = vpop.eup %1041  ;;  %v579_v38 = vmul.f32 %v1040_v34, %v577_v36 }
 0x1e3   : > { %v576_v39 = vmul.f32 %v1042_v37, %v572_v33 }
 0x1e4   : > { %v581_v40 = vmul.f32 %v1024_v8, %v579_v38  ;;  %v583_v41 = vmul.f32 %v1026_v9, %v579_v38  ;;  %v585_v42 = vmul.f32 %v1028_v10, %v579_v38  ;;  %v587_v43 = vmul.f32 %v1030_v12, %v579_v38 }
 0x1e5   : > { %v578_v44 = vsub.f32 2.0, %v576_v39 }
 0x1e6   : > { %v589_v45 = vmul.f32 1.442695, %v581_v40  ;;  %v593_v46 = vmul.f32 1.442695, %v583_v41  ;;  %v597_v47 = vmul.f32 1.442695, %v585_v42 }
 0x1e7   : > { %v601_v48 = vmul.f32 1.442695, %v587_v43  ;;  %v580_v49 = vmul.f32 %v1042_v37, %v578_v44 }
 0x1e8   : > { %1043 = vpow2.f32 %v589_v45 }
 0x1e9   : > { %1045 = vpow2.f32 %v593_v46  ;;  %v582_v50 = vmul.f32 %v1032_v14, %v580_v49  ;;  %v584_v51 = vmul.f32 %v1034_v15, %v580_v49  ;;  %v586_v52 = vmul.f32 %v1036_v17, %v580_v49 }
 0x1ea   : > { %1047 = vpow2.f32 %v597_v47  ;;  %v588_v53 = vmul.f32 %v1038_v19, %v580_v49 }
 0x1eb   : > { %1049 = vpow2.f32 %v601_v48  ;;  %v591_v54 = vmul.f32 1.442695, %v582_v50  ;;  %v595_v55 = vmul.f32 1.442695, %v584_v51  ;;  %v599_v56 = vmul.f32 1.442695, %v586_v52 }
 0x1ec   : > { %v603_v57 = vmul.f32 1.442695, %v588_v53 }
 0x1ed   : > { %1051 = vpow2.f32 %v591_v54 }
 0x1ee   : > { %1053 = vpow2.f32 %v595_v55 }
 0x1ef   : > { %1055 = vpow2.f32 %v599_v56 }
 0x1f0   : > { %1057 = vpow2.f32 %v603_v57 }
 0x1f2   : > { %v1044_v58 = vpop.eup %1043 }
 0x1f3   : > { %v1046_v59 = vpop.eup %1045 }
 0x1f4   : > { %v1048_v60 = vpop.eup %1047  ;;  %v605_v61 = vadd.f32 %v1046_v59, %v1044_v58 }
 0x1f5   : > { %v1050_v62 = vpop.eup %1049 }
 0x1f6   : > { %v606_v63 = vadd.f32 %v1048_v60, %v605_v61 }
 0x1f7   : > { %v1052_v0 = vpop.eup %1051 }
 0x1f8   : > { %v1054_v1 = vpop.eup %1053  ;;  %v607_v2 = vadd.f32 %v1050_v62, %v606_v63 }
 0x1f9   : > { %v1056_v3 = vpop.eup %1055  ;;  %v614_v4 = vadd.f32 %v1054_v1, %v1052_v0 }
 0x1fa   : > { %v1058_v5 = vpop.eup %1057  ;;  %v608_v6 = vrot.slane %v607_v2, 4 }
 0x1fb   : > { %v615_v7 = vadd.f32 %v1056_v3, %v614_v4 }
 0x1fc   : > { %v609_v8 = vadd.f32 %v608_v6, %v607_v2 }
 0x1fd   : > { %v616_v9 = vadd.f32 %v1058_v5, %v615_v7 }
 0x1fe   : > { %v610_v10 = vrot.slane %v609_v8, 2 }
 0x1ff   : > { %v617_v11 = vrot.slane %v616_v9, 4 }
 0x200   : > { %v611_v12 = vadd.f32 %v610_v10, %v609_v8 }
 0x201   : > { %v618_v13 = vadd.f32 %v617_v11, %v616_v9 }
 0x202   : > { %v612_v14 = vrot.slane %v611_v12, 1 }
 0x203   : > { %v619_v15 = vrot.slane %v618_v13, 2 }
 0x204   : > { %v613_v16 = vadd.f32 %v612_v14, %v611_v12 }
 0x205   : > { %v620_v17 = vadd.f32 %v619_v15, %v618_v13 }
 0x206   : > { %1059 = vrcp.f32 %v613_v16 }
 0x207   : > { %v621_v18 = vrot.slane %v620_v17, 1 }
 0x209   : > { %v622_v19 = vadd.f32 %v621_v18, %v620_v17 }
 0x20b   : > { %1061 = vrcp.f32 %v622_v19 }
 0x210   : > { %v1060_v20 = vpop.eup %1059 }
 0x211   : > { %v625_v21 = vmul.f32 %v1060_v20, %v613_v16 }
 0x213   : > { %v627_v22 = vsub.f32 2.0, %v625_v21 }
 0x215   : > { %v1062_v23 = vpop.eup %1061  ;;  %v629_v24 = vmul.f32 %v1060_v20, %v627_v22 }
 0x216   : > { %v626_v25 = vmul.f32 %v1062_v23, %v622_v19 }
 0x217   : > { %v631_v26 = vmul.f32 %v1044_v58, %v629_v24  ;;  %v633_v27 = vmul.f32 %v1046_v59, %v629_v24  ;;  %v635_v28 = vmul.f32 %v1048_v60, %v629_v24  ;;  %v637_v29 = vmul.f32 %v1050_v62, %v629_v24 }
 0x218   : > { %v628_v30 = vsub.f32 2.0, %v626_v25 }
 0x219   : > { %v639_v31 = vmul.f32 1.442695, %v631_v26  ;;  %v643_v32 = vmul.f32 1.442695, %v633_v27  ;;  %v647_v33 = vmul.f32 1.442695, %v635_v28 }
 0x21a   : > { %v651_v34 = vmul.f32 1.442695, %v637_v29  ;;  %v630_v35 = vmul.f32 %v1062_v23, %v628_v30 }
 0x21b   : > { %1063 = vpow2.f32 %v639_v31 }
 0x21c   : > { %1065 = vpow2.f32 %v643_v32  ;;  %v632_v36 = vmul.f32 %v1052_v0, %v630_v35  ;;  %v634_v37 = vmul.f32 %v1054_v1, %v630_v35  ;;  %v636_v38 = vmul.f32 %v1056_v3, %v630_v35 }
 0x21d   : > { %1067 = vpow2.f32 %v647_v33  ;;  %v638_v39 = vmul.f32 %v1058_v5, %v630_v35 }
 0x21e   : > { %1069 = vpow2.f32 %v651_v34  ;;  %v641_v40 = vmul.f32 1.442695, %v632_v36  ;;  %v645_v41 = vmul.f32 1.442695, %v634_v37  ;;  %v649_v42 = vmul.f32 1.442695, %v636_v38 }
 0x21f   : > { %v653_v43 = vmul.f32 1.442695, %v638_v39 }
 0x220   : > { %1071 = vpow2.f32 %v641_v40 }
 0x221   : > { %1073 = vpow2.f32 %v645_v41 }
 0x222   : > { %1075 = vpow2.f32 %v649_v42 }
 0x223   : > { %1077 = vpow2.f32 %v653_v43 }
 0x225   : > { %v1064_v44 = vpop.eup %1063 }
 0x226   : > { %v1066_v45 = vpop.eup %1065 }
 0x227   : > { %v1068_v46 = vpop.eup %1067  ;;  %v655_v47 = vadd.f32 %v1066_v45, %v1064_v44 }
 0x228   : > { %v1070_v48 = vpop.eup %1069 }
 0x229   : > { %v656_v49 = vadd.f32 %v1068_v46, %v655_v47 }
 0x22a   : > { %v1072_v50 = vpop.eup %1071 }
 0x22b   : > { %v1074_v51 = vpop.eup %1073  ;;  %v657_v52 = vadd.f32 %v1070_v48, %v656_v49 }
 0x22c   : > { %v1076_v53 = vpop.eup %1075  ;;  %v664_v54 = vadd.f32 %v1074_v51, %v1072_v50 }
 0x22d   : > { %v1078_v55 = vpop.eup %1077  ;;  %v658_v56 = vrot.slane %v657_v52, 4 }
 0x22e   : > { %v665_v57 = vadd.f32 %v1076_v53, %v664_v54 }
 0x22f   : > { %v659_v58 = vadd.f32 %v658_v56, %v657_v52 }
 0x230   : > { %v666_v59 = vadd.f32 %v1078_v55, %v665_v57 }
 0x231   : > { %v660_v60 = vrot.slane %v659_v58, 2 }
 0x232   : > { %v667_v61 = vrot.slane %v666_v59, 4 }
 0x233   : > { %v661_v62 = vadd.f32 %v660_v60, %v659_v58 }
 0x234   : > { %v668_v63 = vadd.f32 %v667_v61, %v666_v59 }
 0x235   : > { %v662_v0 = vrot.slane %v661_v62, 1 }
 0x236   : > { %v669_v1 = vrot.slane %v668_v63, 2 }
 0x237   : > { %v663_v2 = vadd.f32 %v662_v0, %v661_v62 }
 0x238   : > { %v670_v3 = vadd.f32 %v669_v1, %v668_v63 }
 0x239   : > { %1079 = vrcp.f32 %v663_v2 }
 0x23a   : > { %v671_v4 = vrot.slane %v670_v3, 1 }
 0x23c   : > { %v672_v5 = vadd.f32 %v671_v4, %v670_v3 }
 0x23e   : > { %1081 = vrcp.f32 %v672_v5 }
 0x243   : > { %v1080_v6 = vpop.eup %1079 }
 0x244   : > { %v675_v7 = vmul.f32 %v1080_v6, %v663_v2 }
 0x246   : > { %v677_v8 = vsub.f32 2.0, %v675_v7 }
 0x248   : > { %v1082_v9 = vpop.eup %1081  ;;  %v679_v10 = vmul.f32 %v1080_v6, %v677_v8 }
 0x249   : > { %v676_v11 = vmul.f32 %v1082_v9, %v672_v5 }
 0x24a   : > { %v681_v12 = vmul.f32 %v1064_v44, %v679_v10  ;;  %v683_v13 = vmul.f32 %v1066_v45, %v679_v10  ;;  %v685_v14 = vmul.f32 %v1068_v46, %v679_v10  ;;  %v687_v15 = vmul.f32 %v1070_v48, %v679_v10 }
 0x24b   : > { %v678_v16 = vsub.f32 2.0, %v676_v11 }
 0x24c   : > { %689 = vst [vmem:[%s152_s18] sm:$0xff] %v681_v12  ;;  %691 = vst [vmem:[%s152_s18 + $0x10] sm:$0xff] %v683_v13 }
 0x24d   : > { %693 = vst [vmem:[%s152_s18 + $0x20] sm:$0xff] %v685_v14  ;;  %695 = vst [vmem:[%s152_s18 + $0x30] sm:$0xff] %v687_v15  ;;  %v680_v17 = vmul.f32 %v1082_v9, %v678_v16 }
 0x24f   : > { %v682_v18 = vmul.f32 %v1072_v50, %v680_v17  ;;  %v684_v19 = vmul.f32 %v1074_v51, %v680_v17  ;;  %v686_v20 = vmul.f32 %v1076_v53, %v680_v17  ;;  %v688_v21 = vmul.f32 %v1078_v55, %v680_v17 }
 0x251   : > { %690 = vst [vmem:[%s152_s18 + $0x8] sm:$0xff] %v682_v18  ;;  %692 = vst [vmem:[%s152_s18 + $0x18] sm:$0xff] %v684_v19 }
 0x252   : > { %694 = vst [vmem:[%s152_s18 + $0x28] sm:$0xff] %v686_v20  ;;  %696 = vst [vmem:[%s152_s18 + $0x38] sm:$0xff] %v688_v21 }
 0x253   : > { %1126 = shalt.err (!%p1123_p5)
}
 0x254   : > { %s1127_s17 = scalar_lea.hbm %s1343_s5, 1024  ;;  %s1131_s24 = scalar_lea.hbm %s1393_s1, 2048 }
 0x255   : > { %p1128_p4 = scmp.ne.s32.totalorder %s1343_s5, %s1127_s17  ;;  %p1132_p12 = scmp.lt.u32.totalorder %s1343_s5, %s1393_s1 }
 0x256   : > { %p1133_p1 = scmp.lt.u32.totalorder %s1131_s24, %s1127_s17  ;;  %p1135_p8 = scmp.lt.u32.totalorder %s1127_s17, %s1343_s5 }
 0x257   : > { %p1129_p7 = pnand %p1128_p4, %p1401_p9 }
 0x258   : > { %p1134_p3 = por %p1133_p1, %p1132_p12 }
 0x259   : > { %p1130_p10 = pneg %p1129_p7 }
 0x25a   : > { %p1136_p11 = por %p1135_p8, %p1134_p3 }
 0x25c   : > { %p1137_p0 = pnand %p1136_p11, %p1130_p10 }
 0x25e   : > { %1140 = shalt.err (!%p1137_p0)
}
 0x25f   : > { %s1201_s3 = smov 256   ;;  %s1202_s4 = smov 16  }
 0x260   : > { %819 = dma.vmem_to_hbm [thread:$0]  (%p1401_p9), %s1338_s27, 1024, %s1343_s5, %s698_s9, %s1201_s3, %s1201_s3, %s1202_s4  }
 0x261 PF: > { %s728_s18 = sand.u32 1, %s1175_s6   ;;  %p1402_p6 = scmp.ne.s32.totalorder %s1398_s21, 0 }
 0x262   : > { %p1403_p13 = scmp.ge.s32.totalorder %s1195_s11, 2  ;;  %s729_s29 = scalar_lea.sflag [#allocation4], %s728_s18 }
 0x264   : > { %p826_p2 = pnand %p1403_p13, %p1402_p6 }
 0x266   : > { %1170 = dma.done.wait (!%p826_p2), %s729_s29, 1024  }
 0x267   : > { %1172 = vsyncadd (!%p826_p2), %s729_s29, 4294966272  ;;  %s17_s11 = sadd.s32 1, %s1195_s11   ;;  %s1404_s6 = smov %s1179_s7 }
 0x268   : > { %p14_p5 = scmp.ge.s32.totalorder %s17_s11, 4   ;;  %s1405_s7 = smov %s1183_s8 }
 0x269   : > { %s1406_s8 = smov %s1269_s20  ;;  %s1407_s9 = smov %s1191_s10 }
 0x26a   : > { %s1408_s10 = smov %s1410_s14  ;;  %16 = sbr.rel (!%p14_p5) target bundleno = 6 (0x6), region = 69 }
 0x271   :  { %734 = vsyncpa [#allocation3], 1 }
 0x272   :  { %736 = vsyncpa [#allocation3 + $0x1], 1 }
 0x273   :  { %737 = vsyncpa [#allocation4], 1 }
 0x274   :  { %739 = vsyncpa [#allocation4 + $0x1], 1 }

</bundles_post_ra>
